<compile_context>
chip_gen: v7x
topology: tpu7x:2x2x1
jax: 0.10.0
libtpu: 0.0.40
codegen_flags: <defaults>
</compile_context>

<pallas_src>
import functools

import jax
import jax.numpy as jnp
from jax import lax
from jax.experimental import pallas as pl
from jax.experimental.pallas import tpu as pltpu

LANES = 128
SUBLANES = 8
MIN_KERNEL_ROWS = 1024   # < ~512 KiB per f32 input: XLA fusion beats the kernel.


@functools.lru_cache(maxsize=None)
def _device_params():
    """Returns (tensorcores_per_device, row_tile) for the local TPU generation."""
    kind = ""
    try:
        kind = jax.devices()[0].device_kind.lower()
    except Exception:  # pragma: no cover - e.g. no devices during tracing setup
        pass
    # 2 TensorCores per addressable device: v7x and the v4/v5p megacore parts.
    num_cores = 2 if any(t in kind for t in ("v7", "7x", "v5p", "v4")) else 1
    # v7x drains ~1 MiB blocks 2-4x faster, so grow the block to amortize the
    # fixed ~0.35us/step pipeline overhead; 8192 rows = 4 MiB/input/block stays
    # well under the 32 MiB scoped-VMEM default even if triple-buffered.
    row_tile = 8192 if ("v7" in kind or "7x" in kind) else 2048
    return num_cores, row_tile


def _make_ssd_kernel(rows, tm, bpc, ragged):
    """Sum-of-squared-differences kernel over a (rows, 128) lane-dense slab."""
    nrt = tm // SUBLANES

    def _accumulate(acc_ref, dd):
        # Vreg-shaped accumulator: reduce only across whole (8,128) sub-tiles
        # (pure VPU adds hidden under the DMA); the cross-lane reduction to a
        # scalar is paid once, outside the kernel.
        acc_ref[...] += jnp.sum(dd.reshape(nrt, SUBLANES, LANES), axis=0)

    def kernel(x_ref, y_ref, o_ref, acc_ref):
        c = pl.program_id(0)   # core / partial-sum slot (parallel)
        i = pl.program_id(1)   # row-block within this core (reduction)

        @pl.when(i == 0)
        def _():
            acc_ref[...] = jnp.zeros_like(acc_ref)

        if not ragged:
            d = x_ref[...].astype(jnp.float32) - y_ref[...].astype(jnp.float32)
            _accumulate(acc_ref, d * d)
        else:
            row0 = (c * bpc + i) * tm

            # Fast path: fully interior block, no mask, no iota.
            @pl.when(row0 + tm <= rows)
            def _():
                d = x_ref[...].astype(jnp.float32) - y_ref[...].astype(jnp.float32)
                _accumulate(acc_ref, d * d)

            # Boundary block only: mask rows past the logical end (masking
            # before accumulation, so OOB/stale VMEM contents never matter).
            # Phantom blocks (row0 >= rows) skip compute entirely.
            @pl.when(jnp.logical_and(row0 < rows, row0 + tm > rows))
            def _():
                d = x_ref[...].astype(jnp.float32) - y_ref[...].astype(jnp.float32)
                ridx = row0 + lax.broadcasted_iota(jnp.int32, (tm, LANES), 0)
                _accumulate(acc_ref, jnp.where(ridx < rows, d * d, 0.0))

        @pl.when(i == pl.num_programs(1) - 1)
        def _():
            o_ref[...] = acc_ref[...]

    return kernel


def _sum_squared_diff(x, y, *, row_tile=None, num_cores=None, min_kernel_rows=None):
    """Returns (sum((x-y)**2) as f32, number_of_elements)."""
    assert x.shape == y.shape
    n_valid = 1
    for s in x.shape:
        n_valid *= s

    dev_cores, dev_tile = _device_params()
    row_tile = dev_tile if row_tile is None else row_tile
    num_cores = dev_cores if num_cores is None else num_cores
    min_kernel_rows = MIN_KERNEL_ROWS if min_kernel_rows is None else min_kernel_rows

    # Copy-free fallbacks: tiny inputs (launch/step overhead dominates) and the
    # rare case where the element count is not a multiple of 128 (any lane-dense
    # 2-D view would require a padded/sliced copy, i.e. ~3x HBM traffic; a plain
    # XLA reduction is strictly better there).
    if n_valid % LANES != 0 or (n_valid // LANES) < min_kernel_rows:
        d = x.astype(jnp.float32) - y.astype(jnp.float32)
        return jnp.sum(d * d), n_valid

    rows = n_valid // LANES
    # Free reshape (bitcast) -- no padded copies are ever materialized.
    x2 = jnp.reshape(x, (rows, LANES))
    y2 = jnp.reshape(y, (rows, LANES))

    tm = min(row_tile, (rows // SUBLANES) * SUBLANES)   # multiple of 8, >= 1016
    row_blocks = pl.cdiv(rows, tm)
    num_cores = max(1, min(num_cores, row_blocks))      # no phantom-only cores
    bpc = pl.cdiv(row_blocks, num_cores)                # row-blocks per core
    ragged = (num_cores * bpc * tm != rows)

    def in_map(c, i):
        # Clamp phantom blocks onto the last real block; their compute is
        # skipped in-kernel (only the small redundant DMA remains).
        return (jnp.minimum(c * bpc + i, row_blocks - 1), 0)

    kernel = _make_ssd_kernel(rows, tm, bpc, ragged)

    itemsize = jnp.dtype(x.dtype).itemsize
    # 2 inputs x double-buffered x block bytes, plus slack for output/scratch.
    vmem_limit = max(16 * 1024 * 1024,
                     2 * 2 * tm * LANES * itemsize + 4 * 1024 * 1024)

    # TODO(synk): if an xprof trace on v7x shows exposed DMA at step boundaries,
    # add pipeline_mode=pl.Buffered(3) to the two input BlockSpecs.
    partials = pl.pallas_call(
        kernel,
        out_shape=jax.ShapeDtypeStruct((num_cores * SUBLANES, LANES), jnp.float32),
        grid_spec=pltpu.PrefetchScalarGridSpec(
            num_scalar_prefetch=0,
            grid=(num_cores, bpc),
            in_specs=[
                pl.BlockSpec((tm, LANES), in_map),
                pl.BlockSpec((tm, LANES), in_map),
            ],
            out_specs=pl.BlockSpec((SUBLANES, LANES), lambda c, i: (c, 0)),
            scratch_shapes=[pltpu.VMEM((SUBLANES, LANES), jnp.float32)],
        ),
        compiler_params=pltpu.CompilerParams(
            dimension_semantics=("parallel", "arbitrary"),
            vmem_limit_bytes=vmem_limit,
        ),
        cost_estimate=pl.CostEstimate(
            flops=3 * n_valid,                      # sub, mul, add per element
            transcendentals=0,
            bytes_accessed=2 * n_valid * itemsize,  # stream-read both inputs
        ),
    )(x2, y2)

    # Tiny (<= 16, 128) final reduction -- negligible, done in plain JAX.
    return jnp.sum(partials), n_valid


def sequence_psnr_loss(x, y, max_val=0.5, **tuning_overrides):
    """Pallas equivalent of SequencePSNR_Loss.forward.

    kornia.losses.psnr_loss(x, y, max_val) == -10 * log10(max_val**2 / mse);
    the view() and stack([loss]).mean() in the PyTorch module are identities.
    """
    ssd, n = _sum_squared_diff(x, y, **tuning_overrides)
    mse = ssd / jnp.float32(n)
    return -10.0 * jnp.log10(jnp.float32(max_val) ** 2 / mse)


if __name__ == "__main__":
    key = jax.random.PRNGKey(0)
    kx, ky = jax.random.split(key)

    def ref_loss(a, b, max_val=0.5):
        mse = jnp.mean((a.astype(jnp.float32) - b.astype(jnp.float32)) ** 2)
        return -10.0 * jnp.log10(jnp.float32(max_val) ** 2 / mse)

    # 1) Small (b_len, n, c, h, w) consistent with the module: XLA fast path.
    b_len, n, c, h, w = 2, 2, 4, 16, 16
    x = jax.random.normal(kx, (b_len, n, c, h, w), dtype=jnp.float32)
    y = jax.random.normal(ky, (b_len, n, c, h, w), dtype=jnp.float32)
    loss = sequence_psnr_loss(x, y)
    jax.block_until_ready(loss)
    assert jnp.allclose(loss, ref_loss(x, y), rtol=1e-4, atol=1e-4), (loss, ref_loss(x, y))

    # 2) Larger case: takes the Pallas kernel path with device-default tiling.
    x2 = jax.random.normal(kx, (2, 2, 4, 96, 96), dtype=jnp.float32)
    y2 = jax.random.normal(ky, (2, 2, 4, 96, 96), dtype=jnp.float32)
    loss2 = sequence_psnr_loss(x2, y2)
    jax.block_until_ready(loss2)
    assert jnp.allclose(loss2, ref_loss(x2, y2), rtol=1e-4, atol=1e-4), (loss2, ref_loss(x2, y2))

    # 3) Same data, forced small tile + 2-way core split: exercises the
    #    multi-block grid, phantom-block skipping and the boundary-row mask.
    loss3 = sequence_psnr_loss(x2, y2, row_tile=256, num_cores=2)
    jax.block_until_ready(loss3)
    assert jnp.allclose(loss3, ref_loss(x2, y2), rtol=1e-4, atol=1e-4), (loss3, ref_loss(x2, y2))

    # 4) Element count not a multiple of 128: copy-free XLA fallback path.
    x4 = jax.random.normal(kx, (2, 2, 3, 15, 17), dtype=jnp.float32)
    y4 = jax.random.normal(ky, (2, 2, 3, 15, 17), dtype=jnp.float32)
    loss4 = sequence_psnr_loss(x4, y4)
    jax.block_until_ready(loss4)
    assert jnp.allclose(loss4, ref_loss(x4, y4), rtol=1e-4, atol=1e-4), (loss4, ref_loss(x4, y4))

    print("KERNEL_OK")
</pallas_src>

<mosaic_0001>
module attributes {stable_mosaic.version = 11 : i64} {
  func.func @kernel(%arg0: i32, %arg1: i32, %arg2: memref<1152x128xf32, #tpu.memory_space<vmem>>, %arg3: memref<1152x128xf32, #tpu.memory_space<vmem>>, %arg4: memref<8x128xf32, #tpu.memory_space<vmem>>, %arg5: memref<8x128xf32, #tpu.memory_space<vmem>>) attributes {dimension_semantics = [#tpu.dimension_semantics<parallel>, #tpu.dimension_semantics<arbitrary>], iteration_bounds = array<i64: 1, 1>, scalar_prefetch = 0 : i64, scratch_operands = 1 : i64, tpu.core_type = #tpu.core_type<tc>, window_params = [{transform_indices = @transform_0, window_bounds = array<i64: 1152, 128>}, {transform_indices = @transform_1, window_bounds = array<i64: 1152, 128>}, {transform_indices = @transform_2, window_bounds = array<i64: 8, 128>}]} {
    %c0_i32 = arith.constant 0 : i32
    %0 = arith.cmpi eq, %arg1, %c0_i32 : i32
    %1 = arith.extui %0 : i1 to i32
    %c0_i32_0 = arith.constant 0 : i32
    %2 = arith.cmpi ne, %1, %c0_i32_0 : i32
    scf.if %2 {
      %cst_10 = arith.constant 0.000000e+00 : f32
      %15 = vector.broadcast %cst_10 : f32 to vector<8x128xf32>
      %c0_11 = arith.constant 0 : index
      %c0_12 = arith.constant 0 : index
      %16 = vector.load %arg5[%c0_11, %c0_12] : memref<8x128xf32, #tpu.memory_space<vmem>>, vector<8x128xf32>
      tpu.vector_store %arg5[%c0_11, %c0_12], %15 {strides = array<i32>} : memref<8x128xf32, #tpu.memory_space<vmem>>, vector<8x128xf32>,
    } else {
    }
    %c0 = arith.constant 0 : index
    %c0_1 = arith.constant 0 : index
    %3 = vector.load %arg2[%c0, %c0_1] : memref<1152x128xf32, #tpu.memory_space<vmem>>, vector<1152x128xf32>
    %c0_2 = arith.constant 0 : index
    %c0_3 = arith.constant 0 : index
    %4 = vector.load %arg3[%c0_2, %c0_3] : memref<1152x128xf32, #tpu.memory_space<vmem>>, vector<1152x128xf32>
    %5 = arith.subf %3, %4 : vector<1152x128xf32>
    %6 = arith.mulf %5, %5 : vector<1152x128xf32>
    %c0_4 = arith.constant 0 : index
    %c0_5 = arith.constant 0 : index
    %7 = vector.load %arg5[%c0_4, %c0_5] : memref<8x128xf32, #tpu.memory_space<vmem>>, vector<8x128xf32>
    %8 = vector.shape_cast %6 : vector<1152x128xf32> to vector<144x8x128xf32>
    %cst = arith.constant dense<0.000000e+00> : vector<8x128xf32>
    %9 = vector.multi_reduction <add>, %8, %cst [0] : vector<144x8x128xf32> to vector<8x128xf32>
    %10 = arith.addf %7, %9 : vector<8x128xf32>
    %c0_6 = arith.constant 0 : index
    %c0_7 = arith.constant 0 : index
    %11 = vector.load %arg5[%c0_6, %c0_7] : memref<8x128xf32, #tpu.memory_space<vmem>>, vector<8x128xf32>
    tpu.vector_store %arg5[%c0_6, %c0_7], %10 {strides = array<i32>} : memref<8x128xf32, #tpu.memory_space<vmem>>, vector<8x128xf32>,
    %c0_i32_8 = arith.constant 0 : i32
    %12 = arith.cmpi eq, %arg1, %c0_i32_8 : i32
    %13 = arith.extui %12 : i1 to i32
    %c0_i32_9 = arith.constant 0 : i32
    %14 = arith.cmpi ne, %13, %c0_i32_9 : i32
    scf.if %14 {
      %c0_10 = arith.constant 0 : index
      %c0_11 = arith.constant 0 : index
      %15 = vector.load %arg5[%c0_10, %c0_11] : memref<8x128xf32, #tpu.memory_space<vmem>>, vector<8x128xf32>
      %c0_12 = arith.constant 0 : index
      %c0_13 = arith.constant 0 : index
      %16 = vector.load %arg4[%c0_12, %c0_13] : memref<8x128xf32, #tpu.memory_space<vmem>>, vector<8x128xf32>
      tpu.vector_store %arg4[%c0_12, %c0_13], %15 {strides = array<i32>} : memref<8x128xf32, #tpu.memory_space<vmem>>, vector<8x128xf32>,
    } else {
    }
    return
  }
  func.func @transform_0(%arg0: i32, %arg1: i32) -> (i32, i32) {
    %c1_i32 = arith.constant 1 : i32
    %0 = arith.muli %arg0, %c1_i32 : i32
    %1 = arith.addi %0, %arg1 : i32
    %c0_i32 = arith.constant 0 : i32
    %2 = arith.minsi %1, %c0_i32 : i32
    %c0_i32_0 = arith.constant 0 : i32
    %c0_i32_1 = arith.constant 0 : i32
    return %2, %c0_i32_0 : i32, i32
  }
  func.func @transform_1(%arg0: i32, %arg1: i32) -> (i32, i32) {
    %c1_i32 = arith.constant 1 : i32
    %0 = arith.muli %arg0, %c1_i32 : i32
    %1 = arith.addi %0, %arg1 : i32
    %c0_i32 = arith.constant 0 : i32
    %2 = arith.minsi %1, %c0_i32 : i32
    %c0_i32_0 = arith.constant 0 : i32
    %c0_i32_1 = arith.constant 0 : i32
    return %2, %c0_i32_0 : i32, i32
  }
  func.func @transform_2(%arg0: i32, %arg1: i32) -> (i32, i32) {
    %c0_i32 = arith.constant 0 : i32
    %c0_i32_0 = arith.constant 0 : i32
    return %arg0, %c0_i32 : i32, i32
  }
}

</mosaic_0001>

<bundles_post_ra>
// kernel: tpu_custom_call.1
= control target key start
LH: loop header
LB: loop body
LE: loop exit
PB: predicated region body
PF: predicated region fallthrough
CT: control target
= control target key end

     0   :  { %7 = vsyncpa [#allocation4], 0  ;;  %s945_s0 = inlined_call_operand.hbm [shape: f32[1152,128], index: 0, kind: input, shape index: {}]   ;;  %s946_s1 = inlined_call_operand.hbm [shape: f32[1152,128], index: 1, kind: input, shape index: {}]   ;;  %s947_s2 = inlined_call_operand.hbm [shape: f32[8,128], index: 2, kind: output, shape index: {}]  }
   0x1   :  { %8 = vsyncpa [#allocation7], 0 }
   0x2   :  { %9 = vsyncpa [#allocation5], 0  ;;  %s889_s9 = smov [#allocation3]   ;;  %s817_s13 = scalar_lea.hbm %s945_s0, 18432 }
   0x3   :  { %s21_s10 = sshll.u32 %s889_s9, 4  ;;  %p818_p0 = scmp.ne.s32.totalorder %s945_s0, %s817_s13  ;;  %s22_s10 = int_to_ptr.vmem [resolvable:$true] %s21_s10 }
   0x4   :  { %p821_p1 = scmp.lt.u32.totalorder %s817_s13, %s945_s0 }
   0x6   :  { %p823_p2 = pnand %p821_p1, %p818_p0 }
   0x8   :  { %826 = shalt.err (!%p823_p2)
}
   0x9   :  { %s827_s18 = scalar_lea.vmem %s22_s10, 18432  ;;  %p832_p4 = scmp.lt.s32.totalorder %s22_s10, %s22_s10 }
   0xa   :  { %p828_p3 = scmp.ne.s32.totalorder %s22_s10, %s827_s18  ;;  %p833_p5 = scmp.lt.s32.totalorder %s827_s18, %s827_s18 }
   0xc   :  { %p834_p6 = por %p833_p5, %p832_p4 }
   0xe   :  { %p835_p7 = pnand %p834_p6, %p828_p3 }
  0x10   :  { %838 = shalt.err (!%p835_p7)
}
  0x11   :  { %s890_s19 = smov 128   ;;  %s891_s20 = smov 8  }
  0x12   :  { %27 = dma.hbm_to_vmem [thread:$0]  %s945_s0, 18432, %s22_s10, [#allocation4], %s890_s19, %s890_s19, %s891_s20  }
  0x13   :  { %s892_s23 = smov [#allocation6]   ;;  %s839_s27 = scalar_lea.hbm %s946_s1, 18432 }
  0x14   :  { %s39_s24 = sshll.u32 %s892_s23, 4  ;;  %p840_p8 = scmp.ne.s32.totalorder %s946_s1, %s839_s27  ;;  %s40_s24 = int_to_ptr.vmem [resolvable:$true] %s39_s24 }
  0x15   :  { %p843_p9 = scmp.lt.u32.totalorder %s839_s27, %s946_s1 }
  0x17   :  { %p845_p10 = pnand %p843_p9, %p840_p8 }
  0x19   :  { %848 = shalt.err (!%p845_p10)
}
  0x1a   :  { %s849_s4 = scalar_lea.vmem %s40_s24, 18432  ;;  %p854_p12 = scmp.lt.s32.totalorder %s40_s24, %s40_s24 }
  0x1b   :  { %p850_p11 = scmp.ne.s32.totalorder %s40_s24, %s849_s4  ;;  %p855_p13 = scmp.lt.s32.totalorder %s849_s4, %s849_s4 }
  0x1d   :  { %p856_p0 = por %p855_p13, %p854_p12 }
  0x1f   :  { %p857_p1 = pnand %p856_p0, %p850_p11 }
  0x21   :  { %860 = shalt.err (!%p857_p1)
}
  0x22   :  { %45 = dma.hbm_to_vmem [thread:$0]  %s946_s1, 18432, %s40_s24, [#allocation7], %s890_s19, %s890_s19, %s891_s20  }
  0x23   :  { %883 = dma.done.wait [#allocation4], 18432  }
  0x24   :  { %884 = vsyncadd [#allocation4], 4294948864 }
  0x25   :  { %885 = dma.done.wait [#allocation7], 18432  }
  0x26   :  { %886 = vsyncadd [#allocation7], 4294948864  ;;  %v65_v0 = vld [vmem:[#allocation3] sm:$0xff]  ;;  %v66_v1 = vld [vmem:[#allocation3 + $0x8] sm:$0xff]  ;;  %s893_s1 = smov [#allocation8]  }
  0x27   :  { %v209_v2 = vld [vmem:[#allocation6] sm:$0xff]  ;;  %v210_v3 = vld [vmem:[#allocation6 + $0x8] sm:$0xff]  ;;  %v67_v4 = vld [vmem:[#allocation3 + $0x10] sm:$0xff]  ;;  %s798_s6 = sshll.u32 %s893_s1, 4  ;;  %s799_s6 = int_to_ptr.vmem [resolvable:$true] %s798_s6 }
  0x28   :  { %v211_v5 = vld [vmem:[#allocation6 + $0x10] sm:$0xff]  ;;  %v353_v6 = vsub.f32 %v65_v0, %v209_v2  ;;  %v354_v7 = vsub.f32 %v66_v1, %v210_v3  ;;  %v68_v8 = vld [vmem:[#allocation3 + $0x18] sm:$0xff]  ;;  %v69_v11 = vld [vmem:[#allocation3 + $0x20] sm:$0xff]  ;;  %s861_s7 = scalar_lea.vmem %s799_s6, 128  ;;  %p866_p3 = scmp.lt.s32.totalorder %s799_s6, %s799_s6 }
  0x29   :  { %v212_v9 = vld [vmem:[#allocation6 + $0x18] sm:$0xff]  ;;  %v355_v10 = vsub.f32 %v67_v4, %v211_v5  ;;  %v213_v12 = vld [vmem:[#allocation6 + $0x20] sm:$0xff]  ;;  %v70_v16 = vld [vmem:[#allocation3 + $0x28] sm:$0xff]  ;;  %p862_p2 = scmp.ne.s32.totalorder %s799_s6, %s861_s7  ;;  %p867_p4 = scmp.lt.s32.totalorder %s861_s7, %s861_s7 }
  0x2a   :  { %v356_v13 = vsub.f32 %v68_v8, %v212_v9  ;;  %v497_v14 = vmul.f32 %v353_v6, %v353_v6  ;;  %v498_v15 = vmul.f32 %v354_v7, %v354_v7  ;;  %v214_v17 = vld [vmem:[#allocation6 + $0x28] sm:$0xff]  ;;  %v357_v18 = vsub.f32 %v69_v11, %v213_v12  ;;  %v71_v20 = vld [vmem:[#allocation3 + $0x30] sm:$0xff]  ;;  %v72_v25 = vld [vmem:[#allocation3 + $0x38] sm:$0xff] }
  0x2b   :  { %v499_v19 = vmul.f32 %v355_v10, %v355_v10  ;;  %v215_v21 = vld [vmem:[#allocation6 + $0x30] sm:$0xff]  ;;  %v358_v22 = vsub.f32 %v70_v16, %v214_v17  ;;  %v216_v26 = vld [vmem:[#allocation6 + $0x38] sm:$0xff]  ;;  %v73_v30 = vld [vmem:[#allocation3 + $0x40] sm:$0xff]  ;;  %p868_p5 = por %p867_p4, %p866_p3 }
  0x2c   :  { %v500_v23 = vmul.f32 %v356_v13, %v356_v13  ;;  %v642_v24 = vadd.f32 %v498_v15, %v497_v14  ;;  %v359_v27 = vsub.f32 %v71_v20, %v215_v21  ;;  %v501_v28 = vmul.f32 %v357_v18, %v357_v18  ;;  %v217_v31 = vld [vmem:[#allocation6 + $0x40] sm:$0xff]  ;;  %v74_v35 = vld [vmem:[#allocation3 + $0x48] sm:$0xff]  ;;  %v75_v40 = vld [vmem:[#allocation3 + $0x50] sm:$0xff] }
  0x2d   :  { %v360_v32 = vsub.f32 %v72_v25, %v216_v26  ;;  %v502_v33 = vmul.f32 %v358_v22, %v358_v22  ;;  %v218_v36 = vld [vmem:[#allocation6 + $0x48] sm:$0xff]  ;;  %v361_v37 = vsub.f32 %v73_v30, %v217_v31  ;;  %v219_v41 = vld [vmem:[#allocation6 + $0x50] sm:$0xff]  ;;  %v76_v45 = vld [vmem:[#allocation3 + $0x58] sm:$0xff]  ;;  %p869_p6 = pnand %p868_p5, %p862_p2 }
  0x2e   :  { %v643_v29 = vadd.f32 %v642_v24, %v499_v19  ;;  %v503_v38 = vmul.f32 %v359_v27, %v359_v27  ;;  %v362_v42 = vsub.f32 %v74_v35, %v218_v36  ;;  %v220_v46 = vld [vmem:[#allocation6 + $0x58] sm:$0xff]  ;;  %v363_v47 = vsub.f32 %v75_v40, %v219_v41  ;;  %v77_v50 = vld [vmem:[#allocation3 + $0x60] sm:$0xff]  ;;  %v78_v55 = vld [vmem:[#allocation3 + $0x68] sm:$0xff] }
  0x2f   :  { %v504_v43 = vmul.f32 %v360_v32, %v360_v32  ;;  %v505_v48 = vmul.f32 %v361_v37, %v361_v37  ;;  %v221_v51 = vld [vmem:[#allocation6 + $0x60] sm:$0xff]  ;;  %v364_v52 = vsub.f32 %v76_v45, %v220_v46  ;;  %v222_v56 = vld [vmem:[#allocation6 + $0x68] sm:$0xff]  ;;  %v79_v60 = vld [vmem:[#allocation3 + $0x70] sm:$0xff] }
  0x30   :  { %v644_v34 = vadd.f32 %v643_v29, %v500_v23  ;;  %v506_v53 = vmul.f32 %v362_v42, %v362_v42  ;;  %v365_v57 = vsub.f32 %v77_v50, %v221_v51  ;;  %v507_v58 = vmul.f32 %v363_v47, %v363_v47  ;;  %v223_v61 = vld [vmem:[#allocation6 + $0x70] sm:$0xff]  ;;  %v80_v1 = vld [vmem:[#allocation3 + $0x78] sm:$0xff]  ;;  %v81_v6 = vld [vmem:[#allocation3 + $0x80] sm:$0xff] }
  0x31   :  { %v366_v62 = vsub.f32 %v78_v55, %v222_v56  ;;  %v508_v63 = vmul.f32 %v364_v52, %v364_v52  ;;  %v224_v2 = vld [vmem:[#allocation6 + $0x78] sm:$0xff]  ;;  %v367_v3 = vsub.f32 %v79_v60, %v223_v61  ;;  %v225_v7 = vld [vmem:[#allocation6 + $0x80] sm:$0xff]  ;;  %v82_v11 = vld [vmem:[#allocation3 + $0x88] sm:$0xff] }
  0x32   :  { %v645_v39 = vadd.f32 %v644_v34, %v501_v28  ;;  %v509_v4 = vmul.f32 %v365_v57, %v365_v57  ;;  %v368_v8 = vsub.f32 %v80_v1, %v224_v2  ;;  %v226_v12 = vld [vmem:[#allocation6 + $0x88] sm:$0xff]  ;;  %v369_v13 = vsub.f32 %v81_v6, %v225_v7  ;;  %v83_v16 = vld [vmem:[#allocation3 + $0x90] sm:$0xff]  ;;  %v84_v21 = vld [vmem:[#allocation3 + $0x98] sm:$0xff] }
  0x33   :  { %v510_v9 = vmul.f32 %v366_v62, %v366_v62  ;;  %v511_v14 = vmul.f32 %v367_v3, %v367_v3  ;;  %v227_v17 = vld [vmem:[#allocation6 + $0x90] sm:$0xff]  ;;  %v370_v18 = vsub.f32 %v82_v11, %v226_v12  ;;  %v228_v22 = vld [vmem:[#allocation6 + $0x98] sm:$0xff]  ;;  %v85_v26 = vld [vmem:[#allocation3 + $0xa0] sm:$0xff] }
  0x34   :  { %v646_v44 = vadd.f32 %v645_v39, %v502_v33  ;;  %v512_v19 = vmul.f32 %v368_v8, %v368_v8  ;;  %v371_v23 = vsub.f32 %v83_v16, %v227_v17  ;;  %v513_v24 = vmul.f32 %v369_v13, %v369_v13  ;;  %v229_v27 = vld [vmem:[#allocation6 + $0xa0] sm:$0xff]  ;;  %v86_v31 = vld [vmem:[#allocation3 + $0xa8] sm:$0xff]  ;;  %v87_v36 = vld [vmem:[#allocation3 + $0xb0] sm:$0xff] }
  0x35   :  { %v372_v28 = vsub.f32 %v84_v21, %v228_v22  ;;  %v514_v29 = vmul.f32 %v370_v18, %v370_v18  ;;  %v230_v32 = vld [vmem:[#allocation6 + $0xa8] sm:$0xff]  ;;  %v373_v33 = vsub.f32 %v85_v26, %v229_v27  ;;  %v231_v37 = vld [vmem:[#allocation6 + $0xb0] sm:$0xff]  ;;  %v88_v41 = vld [vmem:[#allocation3 + $0xb8] sm:$0xff] }
  0x36   :  { %v647_v49 = vadd.f32 %v646_v44, %v503_v38  ;;  %v515_v34 = vmul.f32 %v371_v23, %v371_v23  ;;  %v374_v38 = vsub.f32 %v86_v31, %v230_v32  ;;  %v232_v42 = vld [vmem:[#allocation6 + $0xb8] sm:$0xff]  ;;  %v89_v46 = vld [vmem:[#allocation3 + $0xc0] sm:$0xff]  ;;  %v90_v51 = vld [vmem:[#allocation3 + $0xc8] sm:$0xff] }
  0x37   :  { %v516_v39 = vmul.f32 %v372_v28, %v372_v28  ;;  %v517_v44 = vmul.f32 %v373_v33, %v373_v33  ;;  %v233_v47 = vld [vmem:[#allocation6 + $0xc0] sm:$0xff]  ;;  %v234_v52 = vld [vmem:[#allocation6 + $0xc8] sm:$0xff]  ;;  %v91_v56 = vld [vmem:[#allocation3 + $0xd0] sm:$0xff] }
  0x38   :  { %v648_v54 = vadd.f32 %v647_v49, %v504_v43  ;;  %v375_v43 = vsub.f32 %v87_v36, %v231_v37  ;;  %v518_v49 = vmul.f32 %v374_v38, %v374_v38  ;;  %v235_v57 = vld [vmem:[#allocation6 + $0xd0] sm:$0xff]  ;;  %v92_v61 = vld [vmem:[#allocation3 + $0xd8] sm:$0xff]  ;;  %v93_v2 = vld [vmem:[#allocation3 + $0xe0] sm:$0xff] }
  0x39   :  { %v236_v62 = vld [vmem:[#allocation6 + $0xd8] sm:$0xff]  ;;  %v237_v3 = vld [vmem:[#allocation6 + $0xe0] sm:$0xff]  ;;  %v94_v7 = vld [vmem:[#allocation3 + $0xe8] sm:$0xff] }
  0x3a   :  { %v649_v59 = vadd.f32 %v648_v54, %v505_v48  ;;  %v376_v48 = vsub.f32 %v88_v41, %v232_v42  ;;  %v519_v54 = vmul.f32 %v375_v43, %v375_v43  ;;  %v238_v8 = vld [vmem:[#allocation6 + $0xe8] sm:$0xff]  ;;  %v95_v12 = vld [vmem:[#allocation3 + $0xf0] sm:$0xff]  ;;  %v96_v17 = vld [vmem:[#allocation3 + $0xf8] sm:$0xff] }
  0x3b   :  { %v239_v13 = vld [vmem:[#allocation6 + $0xf0] sm:$0xff]  ;;  %v240_v18 = vld [vmem:[#allocation6 + $0xf8] sm:$0xff]  ;;  %v97_v22 = vld [vmem:[#allocation3 + $0x100] sm:$0xff] }
  0x3c   :  { %v650_v0 = vadd.f32 %v649_v59, %v506_v53  ;;  %v377_v53 = vsub.f32 %v89_v46, %v233_v47  ;;  %v520_v59 = vmul.f32 %v376_v48, %v376_v48  ;;  %v241_v23 = vld [vmem:[#allocation6 + $0x100] sm:$0xff]  ;;  %v98_v27 = vld [vmem:[#allocation3 + $0x108] sm:$0xff]  ;;  %v99_v32 = vld [vmem:[#allocation3 + $0x110] sm:$0xff] }
  0x3d   :  { %v242_v28 = vld [vmem:[#allocation6 + $0x108] sm:$0xff]  ;;  %v243_v33 = vld [vmem:[#allocation6 + $0x110] sm:$0xff]  ;;  %v100_v37 = vld [vmem:[#allocation3 + $0x118] sm:$0xff] }
  0x3e   :  { %v651_v5 = vadd.f32 %v650_v0, %v507_v58  ;;  %v378_v58 = vsub.f32 %v90_v51, %v234_v52  ;;  %v521_v0 = vmul.f32 %v377_v53, %v377_v53  ;;  %v244_v38 = vld [vmem:[#allocation6 + $0x118] sm:$0xff]  ;;  %v101_v42 = vld [vmem:[#allocation3 + $0x120] sm:$0xff]  ;;  %v102_v47 = vld [vmem:[#allocation3 + $0x128] sm:$0xff] }
  0x3f   :  { %v245_v43 = vld [vmem:[#allocation6 + $0x120] sm:$0xff]  ;;  %v246_v48 = vld [vmem:[#allocation6 + $0x128] sm:$0xff]  ;;  %v103_v52 = vld [vmem:[#allocation3 + $0x130] sm:$0xff] }
  0x40   :  { %v652_v10 = vadd.f32 %v651_v5, %v508_v63  ;;  %v379_v63 = vsub.f32 %v91_v56, %v235_v57  ;;  %v522_v5 = vmul.f32 %v378_v58, %v378_v58  ;;  %v247_v53 = vld [vmem:[#allocation6 + $0x130] sm:$0xff]  ;;  %v104_v57 = vld [vmem:[#allocation3 + $0x138] sm:$0xff] }
  0x41   :  { %v248_v58 = vld [vmem:[#allocation6 + $0x138] sm:$0xff] }
  0x42   :  { %v653_v15 = vadd.f32 %v652_v10, %v509_v4  ;;  %v380_v4 = vsub.f32 %v92_v61, %v236_v62  ;;  %v523_v10 = vmul.f32 %v379_v63, %v379_v63  ;;  %v105_v62 = vld [vmem:[#allocation3 + $0x140] sm:$0xff] }
  0x43   :  { %v249_v63 = vld [vmem:[#allocation6 + $0x140] sm:$0xff] }
  0x44   :  { %v654_v20 = vadd.f32 %v653_v15, %v510_v9  ;;  %v381_v9 = vsub.f32 %v93_v2, %v237_v3  ;;  %v524_v15 = vmul.f32 %v380_v4, %v380_v4  ;;  %v106_v3 = vld [vmem:[#allocation3 + $0x148] sm:$0xff] }
  0x45   :  { %v250_v4 = vld [vmem:[#allocation6 + $0x148] sm:$0xff] }
  0x46   :  { %v655_v25 = vadd.f32 %v654_v20, %v511_v14  ;;  %v382_v14 = vsub.f32 %v94_v7, %v238_v8  ;;  %v525_v20 = vmul.f32 %v381_v9, %v381_v9  ;;  %v107_v8 = vld [vmem:[#allocation3 + $0x150] sm:$0xff] }
  0x47   :  { %v251_v9 = vld [vmem:[#allocation6 + $0x150] sm:$0xff] }
  0x48   :  { %v656_v30 = vadd.f32 %v655_v25, %v512_v19  ;;  %v383_v19 = vsub.f32 %v95_v12, %v239_v13  ;;  %v526_v25 = vmul.f32 %v382_v14, %v382_v14  ;;  %v108_v13 = vld [vmem:[#allocation3 + $0x158] sm:$0xff] }
  0x49   :  { %v252_v14 = vld [vmem:[#allocation6 + $0x158] sm:$0xff] }
  0x4a   :  { %v657_v35 = vadd.f32 %v656_v30, %v513_v24  ;;  %v384_v24 = vsub.f32 %v96_v17, %v240_v18  ;;  %v527_v30 = vmul.f32 %v383_v19, %v383_v19  ;;  %v109_v18 = vld [vmem:[#allocation3 + $0x160] sm:$0xff] }
  0x4b   :  { %v253_v19 = vld [vmem:[#allocation6 + $0x160] sm:$0xff] }
  0x4c   :  { %v658_v40 = vadd.f32 %v657_v35, %v514_v29  ;;  %v385_v29 = vsub.f32 %v97_v22, %v241_v23  ;;  %v528_v35 = vmul.f32 %v384_v24, %v384_v24  ;;  %v110_v23 = vld [vmem:[#allocation3 + $0x168] sm:$0xff] }
  0x4d   :  { %v254_v24 = vld [vmem:[#allocation6 + $0x168] sm:$0xff] }
  0x4e   :  { %v659_v45 = vadd.f32 %v658_v40, %v515_v34  ;;  %v386_v34 = vsub.f32 %v98_v27, %v242_v28  ;;  %v529_v40 = vmul.f32 %v385_v29, %v385_v29  ;;  %v111_v28 = vld [vmem:[#allocation3 + $0x170] sm:$0xff] }
  0x4f   :  { %v255_v29 = vld [vmem:[#allocation6 + $0x170] sm:$0xff] }
  0x50   :  { %v660_v50 = vadd.f32 %v659_v45, %v516_v39  ;;  %v387_v39 = vsub.f32 %v99_v32, %v243_v33  ;;  %v530_v45 = vmul.f32 %v386_v34, %v386_v34  ;;  %v112_v33 = vld [vmem:[#allocation3 + $0x178] sm:$0xff] }
  0x51   :  { %v256_v34 = vld [vmem:[#allocation6 + $0x178] sm:$0xff] }
  0x52   :  { %v661_v55 = vadd.f32 %v660_v50, %v517_v44  ;;  %v388_v44 = vsub.f32 %v100_v37, %v244_v38  ;;  %v531_v50 = vmul.f32 %v387_v39, %v387_v39  ;;  %v113_v38 = vld [vmem:[#allocation3 + $0x180] sm:$0xff] }
  0x53   :  { %v257_v39 = vld [vmem:[#allocation6 + $0x180] sm:$0xff] }
  0x54   :  { %v662_v60 = vadd.f32 %v661_v55, %v518_v49  ;;  %v389_v49 = vsub.f32 %v101_v42, %v245_v43  ;;  %v532_v55 = vmul.f32 %v388_v44, %v388_v44  ;;  %v114_v43 = vld [vmem:[#allocation3 + $0x188] sm:$0xff] }
  0x55   :  { %v258_v44 = vld [vmem:[#allocation6 + $0x188] sm:$0xff] }
  0x56   :  { %v663_v1 = vadd.f32 %v662_v60, %v519_v54  ;;  %v390_v54 = vsub.f32 %v102_v47, %v246_v48  ;;  %v533_v60 = vmul.f32 %v389_v49, %v389_v49  ;;  %v115_v48 = vld [vmem:[#allocation3 + $0x190] sm:$0xff] }
  0x57   :  { %v259_v49 = vld [vmem:[#allocation6 + $0x190] sm:$0xff] }
  0x58   :  { %v664_v6 = vadd.f32 %v663_v1, %v520_v59  ;;  %v391_v59 = vsub.f32 %v103_v52, %v247_v53  ;;  %v534_v1 = vmul.f32 %v390_v54, %v390_v54  ;;  %v116_v53 = vld [vmem:[#allocation3 + $0x198] sm:$0xff] }
  0x59   :  { %v260_v54 = vld [vmem:[#allocation6 + $0x198] sm:$0xff] }
  0x5a   :  { %v665_v11 = vadd.f32 %v664_v6, %v521_v0  ;;  %v392_v0 = vsub.f32 %v104_v57, %v248_v58  ;;  %v535_v6 = vmul.f32 %v391_v59, %v391_v59  ;;  %v117_v58 = vld [vmem:[#allocation3 + $0x1a0] sm:$0xff] }
  0x5b   :  { %v261_v59 = vld [vmem:[#allocation6 + $0x1a0] sm:$0xff] }
  0x5c   :  { %v666_v16 = vadd.f32 %v665_v11, %v522_v5  ;;  %v393_v5 = vsub.f32 %v105_v62, %v249_v63  ;;  %v536_v11 = vmul.f32 %v392_v0, %v392_v0  ;;  %v118_v63 = vld [vmem:[#allocation3 + $0x1a8] sm:$0xff] }
  0x5d   :  { %v262_v0 = vld [vmem:[#allocation6 + $0x1a8] sm:$0xff] }
  0x5e   :  { %v667_v21 = vadd.f32 %v666_v16, %v523_v10  ;;  %v394_v10 = vsub.f32 %v106_v3, %v250_v4  ;;  %v537_v16 = vmul.f32 %v393_v5, %v393_v5  ;;  %v119_v4 = vld [vmem:[#allocation3 + $0x1b0] sm:$0xff] }
  0x5f   :  { %v263_v5 = vld [vmem:[#allocation6 + $0x1b0] sm:$0xff] }
  0x60   :  { %v668_v26 = vadd.f32 %v667_v21, %v524_v15  ;;  %v395_v15 = vsub.f32 %v107_v8, %v251_v9  ;;  %v538_v21 = vmul.f32 %v394_v10, %v394_v10  ;;  %v120_v9 = vld [vmem:[#allocation3 + $0x1b8] sm:$0xff] }
  0x61   :  { %v264_v10 = vld [vmem:[#allocation6 + $0x1b8] sm:$0xff] }
  0x62   :  { %v669_v31 = vadd.f32 %v668_v26, %v525_v20  ;;  %v396_v20 = vsub.f32 %v108_v13, %v252_v14  ;;  %v539_v26 = vmul.f32 %v395_v15, %v395_v15  ;;  %v121_v14 = vld [vmem:[#allocation3 + $0x1c0] sm:$0xff] }
  0x63   :  { %v265_v15 = vld [vmem:[#allocation6 + $0x1c0] sm:$0xff] }
  0x64   :  { %v670_v36 = vadd.f32 %v669_v31, %v526_v25  ;;  %v397_v25 = vsub.f32 %v109_v18, %v253_v19  ;;  %v540_v31 = vmul.f32 %v396_v20, %v396_v20  ;;  %v122_v19 = vld [vmem:[#allocation3 + $0x1c8] sm:$0xff] }
  0x65   :  { %v266_v20 = vld [vmem:[#allocation6 + $0x1c8] sm:$0xff] }
  0x66   :  { %v671_v41 = vadd.f32 %v670_v36, %v527_v30  ;;  %v398_v30 = vsub.f32 %v110_v23, %v254_v24  ;;  %v541_v36 = vmul.f32 %v397_v25, %v397_v25  ;;  %v123_v24 = vld [vmem:[#allocation3 + $0x1d0] sm:$0xff] }
  0x67   :  { %v267_v25 = vld [vmem:[#allocation6 + $0x1d0] sm:$0xff] }
  0x68   :  { %v672_v46 = vadd.f32 %v671_v41, %v528_v35  ;;  %v399_v35 = vsub.f32 %v111_v28, %v255_v29  ;;  %v542_v41 = vmul.f32 %v398_v30, %v398_v30  ;;  %v124_v29 = vld [vmem:[#allocation3 + $0x1d8] sm:$0xff] }
  0x69   :  { %v268_v30 = vld [vmem:[#allocation6 + $0x1d8] sm:$0xff] }
  0x6a   :  { %v673_v51 = vadd.f32 %v672_v46, %v529_v40  ;;  %v400_v40 = vsub.f32 %v112_v33, %v256_v34  ;;  %v543_v46 = vmul.f32 %v399_v35, %v399_v35  ;;  %v125_v34 = vld [vmem:[#allocation3 + $0x1e0] sm:$0xff] }
  0x6b   :  { %v269_v35 = vld [vmem:[#allocation6 + $0x1e0] sm:$0xff] }
  0x6c   :  { %v674_v56 = vadd.f32 %v673_v51, %v530_v45  ;;  %v401_v45 = vsub.f32 %v113_v38, %v257_v39  ;;  %v544_v51 = vmul.f32 %v400_v40, %v400_v40  ;;  %v126_v39 = vld [vmem:[#allocation3 + $0x1e8] sm:$0xff] }
  0x6d   :  { %v270_v40 = vld [vmem:[#allocation6 + $0x1e8] sm:$0xff] }
  0x6e   :  { %v675_v61 = vadd.f32 %v674_v56, %v531_v50  ;;  %v402_v50 = vsub.f32 %v114_v43, %v258_v44  ;;  %v545_v56 = vmul.f32 %v401_v45, %v401_v45  ;;  %v127_v44 = vld [vmem:[#allocation3 + $0x1f0] sm:$0xff] }
  0x6f   :  { %v271_v45 = vld [vmem:[#allocation6 + $0x1f0] sm:$0xff] }
  0x70   :  { %v676_v2 = vadd.f32 %v675_v61, %v532_v55  ;;  %v403_v55 = vsub.f32 %v115_v48, %v259_v49  ;;  %v546_v61 = vmul.f32 %v402_v50, %v402_v50  ;;  %v128_v49 = vld [vmem:[#allocation3 + $0x1f8] sm:$0xff] }
  0x71   :  { %v272_v50 = vld [vmem:[#allocation6 + $0x1f8] sm:$0xff] }
  0x72   :  { %v677_v7 = vadd.f32 %v676_v2, %v533_v60  ;;  %v404_v60 = vsub.f32 %v116_v53, %v260_v54  ;;  %v547_v2 = vmul.f32 %v403_v55, %v403_v55  ;;  %v129_v54 = vld [vmem:[#allocation3 + $0x200] sm:$0xff] }
  0x73   :  { %v273_v55 = vld [vmem:[#allocation6 + $0x200] sm:$0xff] }
  0x74   :  { %v678_v12 = vadd.f32 %v677_v7, %v534_v1  ;;  %v405_v1 = vsub.f32 %v117_v58, %v261_v59  ;;  %v548_v7 = vmul.f32 %v404_v60, %v404_v60  ;;  %v130_v59 = vld [vmem:[#allocation3 + $0x208] sm:$0xff] }
  0x75   :  { %v274_v60 = vld [vmem:[#allocation6 + $0x208] sm:$0xff] }
  0x76   :  { %v679_v17 = vadd.f32 %v678_v12, %v535_v6  ;;  %v406_v6 = vsub.f32 %v118_v63, %v262_v0  ;;  %v549_v12 = vmul.f32 %v405_v1, %v405_v1  ;;  %v131_v0 = vld [vmem:[#allocation3 + $0x210] sm:$0xff] }
  0x77   :  { %v275_v1 = vld [vmem:[#allocation6 + $0x210] sm:$0xff] }
  0x78   :  { %v680_v22 = vadd.f32 %v679_v17, %v536_v11  ;;  %v407_v11 = vsub.f32 %v119_v4, %v263_v5  ;;  %v550_v17 = vmul.f32 %v406_v6, %v406_v6  ;;  %v132_v5 = vld [vmem:[#allocation3 + $0x218] sm:$0xff] }
  0x79   :  { %v276_v6 = vld [vmem:[#allocation6 + $0x218] sm:$0xff] }
  0x7a   :  { %v681_v27 = vadd.f32 %v680_v22, %v537_v16  ;;  %v408_v16 = vsub.f32 %v120_v9, %v264_v10  ;;  %v551_v22 = vmul.f32 %v407_v11, %v407_v11  ;;  %v133_v10 = vld [vmem:[#allocation3 + $0x220] sm:$0xff] }
  0x7b   :  { %v277_v11 = vld [vmem:[#allocation6 + $0x220] sm:$0xff] }
  0x7c   :  { %v682_v32 = vadd.f32 %v681_v27, %v538_v21  ;;  %v409_v21 = vsub.f32 %v121_v14, %v265_v15  ;;  %v552_v27 = vmul.f32 %v408_v16, %v408_v16  ;;  %v134_v15 = vld [vmem:[#allocation3 + $0x228] sm:$0xff] }
  0x7d   :  { %v278_v16 = vld [vmem:[#allocation6 + $0x228] sm:$0xff] }
  0x7e   :  { %v683_v37 = vadd.f32 %v682_v32, %v539_v26  ;;  %v410_v26 = vsub.f32 %v122_v19, %v266_v20  ;;  %v553_v32 = vmul.f32 %v409_v21, %v409_v21  ;;  %v135_v20 = vld [vmem:[#allocation3 + $0x230] sm:$0xff] }
  0x7f   :  { %v279_v21 = vld [vmem:[#allocation6 + $0x230] sm:$0xff] }
  0x80   :  { %v684_v42 = vadd.f32 %v683_v37, %v540_v31  ;;  %v411_v31 = vsub.f32 %v123_v24, %v267_v25  ;;  %v554_v37 = vmul.f32 %v410_v26, %v410_v26  ;;  %v136_v25 = vld [vmem:[#allocation3 + $0x238] sm:$0xff] }
  0x81   :  { %v280_v26 = vld [vmem:[#allocation6 + $0x238] sm:$0xff] }
  0x82   :  { %v685_v47 = vadd.f32 %v684_v42, %v541_v36  ;;  %v412_v36 = vsub.f32 %v124_v29, %v268_v30  ;;  %v555_v42 = vmul.f32 %v411_v31, %v411_v31  ;;  %v137_v30 = vld [vmem:[#allocation3 + $0x240] sm:$0xff] }
  0x83   :  { %v281_v31 = vld [vmem:[#allocation6 + $0x240] sm:$0xff] }
  0x84   :  { %v686_v52 = vadd.f32 %v685_v47, %v542_v41  ;;  %v413_v41 = vsub.f32 %v125_v34, %v269_v35  ;;  %v556_v47 = vmul.f32 %v412_v36, %v412_v36  ;;  %v138_v35 = vld [vmem:[#allocation3 + $0x248] sm:$0xff] }
  0x85   :  { %v282_v36 = vld [vmem:[#allocation6 + $0x248] sm:$0xff] }
  0x86   :  { %v687_v57 = vadd.f32 %v686_v52, %v543_v46  ;;  %v414_v46 = vsub.f32 %v126_v39, %v270_v40  ;;  %v557_v52 = vmul.f32 %v413_v41, %v413_v41  ;;  %v139_v40 = vld [vmem:[#allocation3 + $0x250] sm:$0xff] }
  0x87   :  { %v283_v41 = vld [vmem:[#allocation6 + $0x250] sm:$0xff] }
  0x88   :  { %v688_v62 = vadd.f32 %v687_v57, %v544_v51  ;;  %v415_v51 = vsub.f32 %v127_v44, %v271_v45  ;;  %v558_v57 = vmul.f32 %v414_v46, %v414_v46  ;;  %v140_v45 = vld [vmem:[#allocation3 + $0x258] sm:$0xff] }
  0x89   :  { %v284_v46 = vld [vmem:[#allocation6 + $0x258] sm:$0xff] }
  0x8a   :  { %v689_v3 = vadd.f32 %v688_v62, %v545_v56  ;;  %v416_v56 = vsub.f32 %v128_v49, %v272_v50  ;;  %v559_v62 = vmul.f32 %v415_v51, %v415_v51  ;;  %v141_v50 = vld [vmem:[#allocation3 + $0x260] sm:$0xff] }
  0x8b   :  { %v285_v51 = vld [vmem:[#allocation6 + $0x260] sm:$0xff] }
  0x8c   :  { %v690_v8 = vadd.f32 %v689_v3, %v546_v61  ;;  %v417_v61 = vsub.f32 %v129_v54, %v273_v55  ;;  %v560_v3 = vmul.f32 %v416_v56, %v416_v56  ;;  %v142_v55 = vld [vmem:[#allocation3 + $0x268] sm:$0xff] }
  0x8d   :  { %v286_v56 = vld [vmem:[#allocation6 + $0x268] sm:$0xff] }
  0x8e   :  { %v691_v13 = vadd.f32 %v690_v8, %v547_v2  ;;  %v418_v2 = vsub.f32 %v130_v59, %v274_v60  ;;  %v561_v8 = vmul.f32 %v417_v61, %v417_v61  ;;  %v143_v60 = vld [vmem:[#allocation3 + $0x270] sm:$0xff] }
  0x8f   :  { %v287_v61 = vld [vmem:[#allocation6 + $0x270] sm:$0xff] }
  0x90   :  { %v692_v18 = vadd.f32 %v691_v13, %v548_v7  ;;  %v419_v7 = vsub.f32 %v131_v0, %v275_v1  ;;  %v562_v13 = vmul.f32 %v418_v2, %v418_v2  ;;  %v144_v1 = vld [vmem:[#allocation3 + $0x278] sm:$0xff] }
  0x91   :  { %v288_v2 = vld [vmem:[#allocation6 + $0x278] sm:$0xff] }
  0x92   :  { %v693_v23 = vadd.f32 %v692_v18, %v549_v12  ;;  %v420_v12 = vsub.f32 %v132_v5, %v276_v6  ;;  %v563_v18 = vmul.f32 %v419_v7, %v419_v7  ;;  %v145_v6 = vld [vmem:[#allocation3 + $0x280] sm:$0xff] }
  0x93   :  { %v289_v7 = vld [vmem:[#allocation6 + $0x280] sm:$0xff] }
  0x94   :  { %v694_v28 = vadd.f32 %v693_v23, %v550_v17  ;;  %v421_v17 = vsub.f32 %v133_v10, %v277_v11  ;;  %v564_v23 = vmul.f32 %v420_v12, %v420_v12  ;;  %v146_v11 = vld [vmem:[#allocation3 + $0x288] sm:$0xff] }
  0x95   :  { %v290_v12 = vld [vmem:[#allocation6 + $0x288] sm:$0xff] }
  0x96   :  { %v695_v33 = vadd.f32 %v694_v28, %v551_v22  ;;  %v422_v22 = vsub.f32 %v134_v15, %v278_v16  ;;  %v565_v28 = vmul.f32 %v421_v17, %v421_v17  ;;  %v147_v16 = vld [vmem:[#allocation3 + $0x290] sm:$0xff] }
  0x97   :  { %v291_v17 = vld [vmem:[#allocation6 + $0x290] sm:$0xff] }
  0x98   :  { %v696_v38 = vadd.f32 %v695_v33, %v552_v27  ;;  %v423_v27 = vsub.f32 %v135_v20, %v279_v21  ;;  %v566_v33 = vmul.f32 %v422_v22, %v422_v22  ;;  %v148_v21 = vld [vmem:[#allocation3 + $0x298] sm:$0xff] }
  0x99   :  { %v292_v22 = vld [vmem:[#allocation6 + $0x298] sm:$0xff] }
  0x9a   :  { %v697_v43 = vadd.f32 %v696_v38, %v553_v32  ;;  %v424_v32 = vsub.f32 %v136_v25, %v280_v26  ;;  %v567_v38 = vmul.f32 %v423_v27, %v423_v27  ;;  %v149_v26 = vld [vmem:[#allocation3 + $0x2a0] sm:$0xff] }
  0x9b   :  { %v293_v27 = vld [vmem:[#allocation6 + $0x2a0] sm:$0xff] }
  0x9c   :  { %v698_v48 = vadd.f32 %v697_v43, %v554_v37  ;;  %v425_v37 = vsub.f32 %v137_v30, %v281_v31  ;;  %v568_v43 = vmul.f32 %v424_v32, %v424_v32  ;;  %v150_v31 = vld [vmem:[#allocation3 + $0x2a8] sm:$0xff] }
  0x9d   :  { %v294_v32 = vld [vmem:[#allocation6 + $0x2a8] sm:$0xff] }
  0x9e   :  { %v699_v53 = vadd.f32 %v698_v48, %v555_v42  ;;  %v426_v42 = vsub.f32 %v138_v35, %v282_v36  ;;  %v569_v48 = vmul.f32 %v425_v37, %v425_v37  ;;  %v151_v36 = vld [vmem:[#allocation3 + $0x2b0] sm:$0xff] }
  0x9f   :  { %v295_v37 = vld [vmem:[#allocation6 + $0x2b0] sm:$0xff] }
  0xa0   :  { %v700_v58 = vadd.f32 %v699_v53, %v556_v47  ;;  %v427_v47 = vsub.f32 %v139_v40, %v283_v41  ;;  %v570_v53 = vmul.f32 %v426_v42, %v426_v42  ;;  %v152_v41 = vld [vmem:[#allocation3 + $0x2b8] sm:$0xff] }
  0xa1   :  { %v296_v42 = vld [vmem:[#allocation6 + $0x2b8] sm:$0xff] }
  0xa2   :  { %v701_v63 = vadd.f32 %v700_v58, %v557_v52  ;;  %v428_v52 = vsub.f32 %v140_v45, %v284_v46  ;;  %v571_v58 = vmul.f32 %v427_v47, %v427_v47  ;;  %v153_v46 = vld [vmem:[#allocation3 + $0x2c0] sm:$0xff] }
  0xa3   :  { %v297_v47 = vld [vmem:[#allocation6 + $0x2c0] sm:$0xff] }
  0xa4   :  { %v702_v4 = vadd.f32 %v701_v63, %v558_v57  ;;  %v429_v57 = vsub.f32 %v141_v50, %v285_v51  ;;  %v572_v63 = vmul.f32 %v428_v52, %v428_v52  ;;  %v154_v51 = vld [vmem:[#allocation3 + $0x2c8] sm:$0xff] }
  0xa5   :  { %v298_v52 = vld [vmem:[#allocation6 + $0x2c8] sm:$0xff] }
  0xa6   :  { %v703_v9 = vadd.f32 %v702_v4, %v559_v62  ;;  %v430_v62 = vsub.f32 %v142_v55, %v286_v56  ;;  %v573_v4 = vmul.f32 %v429_v57, %v429_v57  ;;  %v155_v56 = vld [vmem:[#allocation3 + $0x2d0] sm:$0xff] }
  0xa7   :  { %v299_v57 = vld [vmem:[#allocation6 + $0x2d0] sm:$0xff] }
  0xa8   :  { %v704_v14 = vadd.f32 %v703_v9, %v560_v3  ;;  %v431_v3 = vsub.f32 %v143_v60, %v287_v61  ;;  %v574_v9 = vmul.f32 %v430_v62, %v430_v62  ;;  %v156_v61 = vld [vmem:[#allocation3 + $0x2d8] sm:$0xff] }
  0xa9   :  { %v300_v62 = vld [vmem:[#allocation6 + $0x2d8] sm:$0xff] }
  0xaa   :  { %v705_v19 = vadd.f32 %v704_v14, %v561_v8  ;;  %v432_v8 = vsub.f32 %v144_v1, %v288_v2  ;;  %v575_v14 = vmul.f32 %v431_v3, %v431_v3  ;;  %v157_v2 = vld [vmem:[#allocation3 + $0x2e0] sm:$0xff] }
  0xab   :  { %v301_v3 = vld [vmem:[#allocation6 + $0x2e0] sm:$0xff] }
  0xac   :  { %v706_v24 = vadd.f32 %v705_v19, %v562_v13  ;;  %v433_v13 = vsub.f32 %v145_v6, %v289_v7  ;;  %v576_v19 = vmul.f32 %v432_v8, %v432_v8  ;;  %v158_v7 = vld [vmem:[#allocation3 + $0x2e8] sm:$0xff] }
  0xad   :  { %v302_v8 = vld [vmem:[#allocation6 + $0x2e8] sm:$0xff] }
  0xae   :  { %v707_v29 = vadd.f32 %v706_v24, %v563_v18  ;;  %v434_v18 = vsub.f32 %v146_v11, %v290_v12  ;;  %v577_v24 = vmul.f32 %v433_v13, %v433_v13  ;;  %v159_v12 = vld [vmem:[#allocation3 + $0x2f0] sm:$0xff] }
  0xaf   :  { %v303_v13 = vld [vmem:[#allocation6 + $0x2f0] sm:$0xff] }
  0xb0   :  { %v708_v34 = vadd.f32 %v707_v29, %v564_v23  ;;  %v435_v23 = vsub.f32 %v147_v16, %v291_v17  ;;  %v578_v29 = vmul.f32 %v434_v18, %v434_v18  ;;  %v160_v17 = vld [vmem:[#allocation3 + $0x2f8] sm:$0xff] }
  0xb1   :  { %v304_v18 = vld [vmem:[#allocation6 + $0x2f8] sm:$0xff] }
  0xb2   :  { %v709_v39 = vadd.f32 %v708_v34, %v565_v28  ;;  %v436_v28 = vsub.f32 %v148_v21, %v292_v22  ;;  %v579_v34 = vmul.f32 %v435_v23, %v435_v23  ;;  %v161_v22 = vld [vmem:[#allocation3 + $0x300] sm:$0xff] }
  0xb3   :  { %v305_v23 = vld [vmem:[#allocation6 + $0x300] sm:$0xff] }
  0xb4   :  { %v710_v44 = vadd.f32 %v709_v39, %v566_v33  ;;  %v437_v33 = vsub.f32 %v149_v26, %v293_v27  ;;  %v580_v39 = vmul.f32 %v436_v28, %v436_v28  ;;  %v162_v27 = vld [vmem:[#allocation3 + $0x308] sm:$0xff] }
  0xb5   :  { %v306_v28 = vld [vmem:[#allocation6 + $0x308] sm:$0xff] }
  0xb6   :  { %v711_v49 = vadd.f32 %v710_v44, %v567_v38  ;;  %v438_v38 = vsub.f32 %v150_v31, %v294_v32  ;;  %v581_v44 = vmul.f32 %v437_v33, %v437_v33  ;;  %v163_v32 = vld [vmem:[#allocation3 + $0x310] sm:$0xff] }
  0xb7   :  { %v307_v33 = vld [vmem:[#allocation6 + $0x310] sm:$0xff] }
  0xb8   :  { %v712_v54 = vadd.f32 %v711_v49, %v568_v43  ;;  %v439_v43 = vsub.f32 %v151_v36, %v295_v37  ;;  %v582_v49 = vmul.f32 %v438_v38, %v438_v38  ;;  %v164_v37 = vld [vmem:[#allocation3 + $0x318] sm:$0xff] }
  0xb9   :  { %v308_v38 = vld [vmem:[#allocation6 + $0x318] sm:$0xff] }
  0xba   :  { %v713_v59 = vadd.f32 %v712_v54, %v569_v48  ;;  %v440_v48 = vsub.f32 %v152_v41, %v296_v42  ;;  %v583_v54 = vmul.f32 %v439_v43, %v439_v43  ;;  %v165_v42 = vld [vmem:[#allocation3 + $0x320] sm:$0xff] }
  0xbb   :  { %v309_v43 = vld [vmem:[#allocation6 + $0x320] sm:$0xff] }
  0xbc   :  { %v714_v0 = vadd.f32 %v713_v59, %v570_v53  ;;  %v441_v53 = vsub.f32 %v153_v46, %v297_v47  ;;  %v584_v59 = vmul.f32 %v440_v48, %v440_v48  ;;  %v166_v47 = vld [vmem:[#allocation3 + $0x328] sm:$0xff] }
  0xbd   :  { %v310_v48 = vld [vmem:[#allocation6 + $0x328] sm:$0xff] }
  0xbe   :  { %v715_v5 = vadd.f32 %v714_v0, %v571_v58  ;;  %v442_v58 = vsub.f32 %v154_v51, %v298_v52  ;;  %v585_v0 = vmul.f32 %v441_v53, %v441_v53  ;;  %v167_v52 = vld [vmem:[#allocation3 + $0x330] sm:$0xff] }
  0xbf   :  { %v311_v53 = vld [vmem:[#allocation6 + $0x330] sm:$0xff] }
  0xc0   :  { %v716_v10 = vadd.f32 %v715_v5, %v572_v63  ;;  %v443_v63 = vsub.f32 %v155_v56, %v299_v57  ;;  %v586_v5 = vmul.f32 %v442_v58, %v442_v58  ;;  %v168_v57 = vld [vmem:[#allocation3 + $0x338] sm:$0xff] }
  0xc1   :  { %v312_v58 = vld [vmem:[#allocation6 + $0x338] sm:$0xff] }
  0xc2   :  { %v717_v15 = vadd.f32 %v716_v10, %v573_v4  ;;  %v444_v4 = vsub.f32 %v156_v61, %v300_v62  ;;  %v587_v10 = vmul.f32 %v443_v63, %v443_v63  ;;  %v169_v62 = vld [vmem:[#allocation3 + $0x340] sm:$0xff] }
  0xc3   :  { %v313_v63 = vld [vmem:[#allocation6 + $0x340] sm:$0xff] }
  0xc4   :  { %v718_v20 = vadd.f32 %v717_v15, %v574_v9  ;;  %v445_v9 = vsub.f32 %v157_v2, %v301_v3  ;;  %v588_v15 = vmul.f32 %v444_v4, %v444_v4  ;;  %v170_v3 = vld [vmem:[#allocation3 + $0x348] sm:$0xff] }
  0xc5   :  { %v314_v4 = vld [vmem:[#allocation6 + $0x348] sm:$0xff] }
  0xc6   :  { %v719_v25 = vadd.f32 %v718_v20, %v575_v14  ;;  %v446_v14 = vsub.f32 %v158_v7, %v302_v8  ;;  %v589_v20 = vmul.f32 %v445_v9, %v445_v9  ;;  %v171_v8 = vld [vmem:[#allocation3 + $0x350] sm:$0xff] }
  0xc7   :  { %v315_v9 = vld [vmem:[#allocation6 + $0x350] sm:$0xff] }
  0xc8   :  { %v720_v30 = vadd.f32 %v719_v25, %v576_v19  ;;  %v447_v19 = vsub.f32 %v159_v12, %v303_v13  ;;  %v590_v25 = vmul.f32 %v446_v14, %v446_v14  ;;  %v172_v13 = vld [vmem:[#allocation3 + $0x358] sm:$0xff] }
  0xc9   :  { %v316_v14 = vld [vmem:[#allocation6 + $0x358] sm:$0xff] }
  0xca   :  { %v721_v35 = vadd.f32 %v720_v30, %v577_v24  ;;  %v448_v24 = vsub.f32 %v160_v17, %v304_v18  ;;  %v591_v30 = vmul.f32 %v447_v19, %v447_v19  ;;  %v173_v18 = vld [vmem:[#allocation3 + $0x360] sm:$0xff] }
  0xcb   :  { %v317_v19 = vld [vmem:[#allocation6 + $0x360] sm:$0xff] }
  0xcc   :  { %v722_v40 = vadd.f32 %v721_v35, %v578_v29  ;;  %v449_v29 = vsub.f32 %v161_v22, %v305_v23  ;;  %v592_v35 = vmul.f32 %v448_v24, %v448_v24  ;;  %v174_v23 = vld [vmem:[#allocation3 + $0x368] sm:$0xff] }
  0xcd   :  { %v318_v24 = vld [vmem:[#allocation6 + $0x368] sm:$0xff] }
  0xce   :  { %v723_v45 = vadd.f32 %v722_v40, %v579_v34  ;;  %v450_v34 = vsub.f32 %v162_v27, %v306_v28  ;;  %v593_v40 = vmul.f32 %v449_v29, %v449_v29  ;;  %v175_v28 = vld [vmem:[#allocation3 + $0x370] sm:$0xff] }
  0xcf   :  { %v319_v29 = vld [vmem:[#allocation6 + $0x370] sm:$0xff] }
  0xd0   :  { %v724_v50 = vadd.f32 %v723_v45, %v580_v39  ;;  %v451_v39 = vsub.f32 %v163_v32, %v307_v33  ;;  %v594_v45 = vmul.f32 %v450_v34, %v450_v34  ;;  %v176_v33 = vld [vmem:[#allocation3 + $0x378] sm:$0xff] }
  0xd1   :  { %v320_v34 = vld [vmem:[#allocation6 + $0x378] sm:$0xff] }
  0xd2   :  { %v725_v55 = vadd.f32 %v724_v50, %v581_v44  ;;  %v452_v44 = vsub.f32 %v164_v37, %v308_v38  ;;  %v595_v50 = vmul.f32 %v451_v39, %v451_v39  ;;  %v177_v38 = vld [vmem:[#allocation3 + $0x380] sm:$0xff] }
  0xd3   :  { %v321_v39 = vld [vmem:[#allocation6 + $0x380] sm:$0xff] }
  0xd4   :  { %v726_v60 = vadd.f32 %v725_v55, %v582_v49  ;;  %v453_v49 = vsub.f32 %v165_v42, %v309_v43  ;;  %v596_v55 = vmul.f32 %v452_v44, %v452_v44  ;;  %v178_v43 = vld [vmem:[#allocation3 + $0x388] sm:$0xff] }
  0xd5   :  { %v322_v44 = vld [vmem:[#allocation6 + $0x388] sm:$0xff] }
  0xd6   :  { %v727_v1 = vadd.f32 %v726_v60, %v583_v54  ;;  %v454_v54 = vsub.f32 %v166_v47, %v310_v48  ;;  %v597_v60 = vmul.f32 %v453_v49, %v453_v49  ;;  %v179_v48 = vld [vmem:[#allocation3 + $0x390] sm:$0xff] }
  0xd7   :  { %v323_v49 = vld [vmem:[#allocation6 + $0x390] sm:$0xff] }
  0xd8   :  { %v728_v6 = vadd.f32 %v727_v1, %v584_v59  ;;  %v455_v59 = vsub.f32 %v167_v52, %v311_v53  ;;  %v598_v1 = vmul.f32 %v454_v54, %v454_v54  ;;  %v180_v53 = vld [vmem:[#allocation3 + $0x398] sm:$0xff] }
  0xd9   :  { %v324_v54 = vld [vmem:[#allocation6 + $0x398] sm:$0xff] }
  0xda   :  { %v729_v11 = vadd.f32 %v728_v6, %v585_v0  ;;  %v456_v0 = vsub.f32 %v168_v57, %v312_v58  ;;  %v599_v6 = vmul.f32 %v455_v59, %v455_v59  ;;  %v181_v58 = vld [vmem:[#allocation3 + $0x3a0] sm:$0xff] }
  0xdb   :  { %v325_v59 = vld [vmem:[#allocation6 + $0x3a0] sm:$0xff] }
  0xdc   :  { %v730_v16 = vadd.f32 %v729_v11, %v586_v5  ;;  %v457_v5 = vsub.f32 %v169_v62, %v313_v63  ;;  %v600_v11 = vmul.f32 %v456_v0, %v456_v0  ;;  %v182_v63 = vld [vmem:[#allocation3 + $0x3a8] sm:$0xff] }
  0xdd   :  { %v326_v0 = vld [vmem:[#allocation6 + $0x3a8] sm:$0xff] }
  0xde   :  { %v731_v21 = vadd.f32 %v730_v16, %v587_v10  ;;  %v458_v10 = vsub.f32 %v170_v3, %v314_v4  ;;  %v601_v16 = vmul.f32 %v457_v5, %v457_v5  ;;  %v183_v4 = vld [vmem:[#allocation3 + $0x3b0] sm:$0xff] }
  0xdf   :  { %v327_v5 = vld [vmem:[#allocation6 + $0x3b0] sm:$0xff] }
  0xe0   :  { %v732_v26 = vadd.f32 %v731_v21, %v588_v15  ;;  %v459_v15 = vsub.f32 %v171_v8, %v315_v9  ;;  %v602_v21 = vmul.f32 %v458_v10, %v458_v10  ;;  %v184_v9 = vld [vmem:[#allocation3 + $0x3b8] sm:$0xff] }
  0xe1   :  { %v328_v10 = vld [vmem:[#allocation6 + $0x3b8] sm:$0xff] }
  0xe2   :  { %v733_v31 = vadd.f32 %v732_v26, %v589_v20  ;;  %v460_v20 = vsub.f32 %v172_v13, %v316_v14  ;;  %v603_v26 = vmul.f32 %v459_v15, %v459_v15  ;;  %v185_v14 = vld [vmem:[#allocation3 + $0x3c0] sm:$0xff] }
  0xe3   :  { %v329_v15 = vld [vmem:[#allocation6 + $0x3c0] sm:$0xff] }
  0xe4   :  { %v734_v36 = vadd.f32 %v733_v31, %v590_v25  ;;  %v461_v25 = vsub.f32 %v173_v18, %v317_v19  ;;  %v604_v31 = vmul.f32 %v460_v20, %v460_v20  ;;  %v186_v19 = vld [vmem:[#allocation3 + $0x3c8] sm:$0xff] }
  0xe5   :  { %v330_v20 = vld [vmem:[#allocation6 + $0x3c8] sm:$0xff] }
  0xe6   :  { %v735_v41 = vadd.f32 %v734_v36, %v591_v30  ;;  %v462_v30 = vsub.f32 %v174_v23, %v318_v24  ;;  %v605_v36 = vmul.f32 %v461_v25, %v461_v25  ;;  %v187_v24 = vld [vmem:[#allocation3 + $0x3d0] sm:$0xff] }
  0xe7   :  { %v331_v25 = vld [vmem:[#allocation6 + $0x3d0] sm:$0xff] }
  0xe8   :  { %v736_v46 = vadd.f32 %v735_v41, %v592_v35  ;;  %v463_v35 = vsub.f32 %v175_v28, %v319_v29  ;;  %v606_v41 = vmul.f32 %v462_v30, %v462_v30  ;;  %v188_v29 = vld [vmem:[#allocation3 + $0x3d8] sm:$0xff] }
  0xe9   :  { %v332_v30 = vld [vmem:[#allocation6 + $0x3d8] sm:$0xff] }
  0xea   :  { %v737_v51 = vadd.f32 %v736_v46, %v593_v40  ;;  %v464_v40 = vsub.f32 %v176_v33, %v320_v34  ;;  %v607_v46 = vmul.f32 %v463_v35, %v463_v35  ;;  %v189_v34 = vld [vmem:[#allocation3 + $0x3e0] sm:$0xff] }
  0xeb   :  { %v333_v35 = vld [vmem:[#allocation6 + $0x3e0] sm:$0xff] }
  0xec   :  { %v738_v56 = vadd.f32 %v737_v51, %v594_v45  ;;  %v465_v45 = vsub.f32 %v177_v38, %v321_v39  ;;  %v608_v51 = vmul.f32 %v464_v40, %v464_v40  ;;  %v190_v39 = vld [vmem:[#allocation3 + $0x3e8] sm:$0xff] }
  0xed   :  { %v334_v40 = vld [vmem:[#allocation6 + $0x3e8] sm:$0xff] }
  0xee   :  { %v739_v61 = vadd.f32 %v738_v56, %v595_v50  ;;  %v466_v50 = vsub.f32 %v178_v43, %v322_v44  ;;  %v609_v56 = vmul.f32 %v465_v45, %v465_v45  ;;  %v191_v44 = vld [vmem:[#allocation3 + $0x3f0] sm:$0xff] }
  0xef   :  { %v335_v45 = vld [vmem:[#allocation6 + $0x3f0] sm:$0xff] }
  0xf0   :  { %v740_v2 = vadd.f32 %v739_v61, %v596_v55  ;;  %v467_v55 = vsub.f32 %v179_v48, %v323_v49  ;;  %v610_v61 = vmul.f32 %v466_v50, %v466_v50  ;;  %v192_v49 = vld [vmem:[#allocation3 + $0x3f8] sm:$0xff] }
  0xf1   :  { %v336_v50 = vld [vmem:[#allocation6 + $0x3f8] sm:$0xff] }
  0xf2   :  { %v741_v7 = vadd.f32 %v740_v2, %v597_v60  ;;  %v468_v60 = vsub.f32 %v180_v53, %v324_v54  ;;  %v611_v2 = vmul.f32 %v467_v55, %v467_v55  ;;  %v193_v54 = vld [vmem:[#allocation3 + $0x400] sm:$0xff] }
  0xf3   :  { %v337_v55 = vld [vmem:[#allocation6 + $0x400] sm:$0xff] }
  0xf4   :  { %v742_v12 = vadd.f32 %v741_v7, %v598_v1  ;;  %v469_v1 = vsub.f32 %v181_v58, %v325_v59  ;;  %v612_v7 = vmul.f32 %v468_v60, %v468_v60  ;;  %v194_v59 = vld [vmem:[#allocation3 + $0x408] sm:$0xff] }
  0xf5   :  { %v338_v60 = vld [vmem:[#allocation6 + $0x408] sm:$0xff] }
  0xf6   :  { %v743_v17 = vadd.f32 %v742_v12, %v599_v6  ;;  %v470_v6 = vsub.f32 %v182_v63, %v326_v0  ;;  %v613_v12 = vmul.f32 %v469_v1, %v469_v1  ;;  %v195_v0 = vld [vmem:[#allocation3 + $0x410] sm:$0xff] }
  0xf7   :  { %v339_v1 = vld [vmem:[#allocation6 + $0x410] sm:$0xff] }
  0xf8   :  { %v744_v22 = vadd.f32 %v743_v17, %v600_v11  ;;  %v471_v11 = vsub.f32 %v183_v4, %v327_v5  ;;  %v614_v17 = vmul.f32 %v470_v6, %v470_v6  ;;  %v196_v5 = vld [vmem:[#allocation3 + $0x418] sm:$0xff] }
  0xf9   :  { %v340_v6 = vld [vmem:[#allocation6 + $0x418] sm:$0xff] }
  0xfa   :  { %v745_v27 = vadd.f32 %v744_v22, %v601_v16  ;;  %v472_v16 = vsub.f32 %v184_v9, %v328_v10  ;;  %v615_v22 = vmul.f32 %v471_v11, %v471_v11  ;;  %v197_v10 = vld [vmem:[#allocation3 + $0x420] sm:$0xff] }
  0xfb   :  { %v341_v11 = vld [vmem:[#allocation6 + $0x420] sm:$0xff] }
  0xfc   :  { %v746_v32 = vadd.f32 %v745_v27, %v602_v21  ;;  %v473_v21 = vsub.f32 %v185_v14, %v329_v15  ;;  %v616_v27 = vmul.f32 %v472_v16, %v472_v16  ;;  %v198_v15 = vld [vmem:[#allocation3 + $0x428] sm:$0xff] }
  0xfd   :  { %v342_v16 = vld [vmem:[#allocation6 + $0x428] sm:$0xff] }
  0xfe   :  { %v747_v37 = vadd.f32 %v746_v32, %v603_v26  ;;  %v474_v26 = vsub.f32 %v186_v19, %v330_v20  ;;  %v617_v32 = vmul.f32 %v473_v21, %v473_v21  ;;  %v199_v20 = vld [vmem:[#allocation3 + $0x430] sm:$0xff] }
  0xff   :  { %v343_v21 = vld [vmem:[#allocation6 + $0x430] sm:$0xff] }
 0x100   :  { %v748_v42 = vadd.f32 %v747_v37, %v604_v31  ;;  %v475_v31 = vsub.f32 %v187_v24, %v331_v25  ;;  %v618_v37 = vmul.f32 %v474_v26, %v474_v26  ;;  %v200_v25 = vld [vmem:[#allocation3 + $0x438] sm:$0xff] }
 0x101   :  { %v344_v26 = vld [vmem:[#allocation6 + $0x438] sm:$0xff] }
 0x102   :  { %v749_v47 = vadd.f32 %v748_v42, %v605_v36  ;;  %v476_v36 = vsub.f32 %v188_v29, %v332_v30  ;;  %v619_v42 = vmul.f32 %v475_v31, %v475_v31  ;;  %v201_v30 = vld [vmem:[#allocation3 + $0x440] sm:$0xff] }
 0x103   :  { %v345_v31 = vld [vmem:[#allocation6 + $0x440] sm:$0xff] }
 0x104   :  { %v750_v52 = vadd.f32 %v749_v47, %v606_v41  ;;  %v477_v41 = vsub.f32 %v189_v34, %v333_v35  ;;  %v620_v47 = vmul.f32 %v476_v36, %v476_v36  ;;  %v202_v35 = vld [vmem:[#allocation3 + $0x448] sm:$0xff] }
 0x105   :  { %v346_v36 = vld [vmem:[#allocation6 + $0x448] sm:$0xff] }
 0x106   :  { %v751_v57 = vadd.f32 %v750_v52, %v607_v46  ;;  %v478_v46 = vsub.f32 %v190_v39, %v334_v40  ;;  %v621_v52 = vmul.f32 %v477_v41, %v477_v41  ;;  %v203_v40 = vld [vmem:[#allocation3 + $0x450] sm:$0xff] }
 0x107   :  { %v347_v41 = vld [vmem:[#allocation6 + $0x450] sm:$0xff] }
 0x108   :  { %v752_v62 = vadd.f32 %v751_v57, %v608_v51  ;;  %v479_v51 = vsub.f32 %v191_v44, %v335_v45  ;;  %v622_v57 = vmul.f32 %v478_v46, %v478_v46  ;;  %v204_v45 = vld [vmem:[#allocation3 + $0x458] sm:$0xff] }
 0x109   :  { %v348_v46 = vld [vmem:[#allocation6 + $0x458] sm:$0xff] }
 0x10a   :  { %v753_v3 = vadd.f32 %v752_v62, %v609_v56  ;;  %v480_v56 = vsub.f32 %v192_v49, %v336_v50  ;;  %v623_v62 = vmul.f32 %v479_v51, %v479_v51  ;;  %v205_v50 = vld [vmem:[#allocation3 + $0x460] sm:$0xff] }
 0x10b   :  { %v349_v51 = vld [vmem:[#allocation6 + $0x460] sm:$0xff] }
 0x10c   :  { %v754_v8 = vadd.f32 %v753_v3, %v610_v61  ;;  %v481_v61 = vsub.f32 %v193_v54, %v337_v55  ;;  %v624_v3 = vmul.f32 %v480_v56, %v480_v56  ;;  %v206_v55 = vld [vmem:[#allocation3 + $0x468] sm:$0xff] }
 0x10d   :  { %v350_v56 = vld [vmem:[#allocation6 + $0x468] sm:$0xff] }
 0x10e   :  { %v755_v13 = vadd.f32 %v754_v8, %v611_v2  ;;  %v482_v2 = vsub.f32 %v194_v59, %v338_v60  ;;  %v625_v8 = vmul.f32 %v481_v61, %v481_v61  ;;  %v207_v60 = vld [vmem:[#allocation3 + $0x470] sm:$0xff] }
 0x10f   :  { %v351_v61 = vld [vmem:[#allocation6 + $0x470] sm:$0xff] }
 0x110   :  { %v756_v18 = vadd.f32 %v755_v13, %v612_v7  ;;  %v483_v7 = vsub.f32 %v195_v0, %v339_v1  ;;  %v626_v13 = vmul.f32 %v482_v2, %v482_v2  ;;  %v208_v1 = vld [vmem:[#allocation3 + $0x478] sm:$0xff] }
 0x111   :  { %v352_v2 = vld [vmem:[#allocation6 + $0x478] sm:$0xff] }
 0x112   :  { %v757_v23 = vadd.f32 %v756_v18, %v613_v12  ;;  %v484_v12 = vsub.f32 %v196_v5, %v340_v6  ;;  %v627_v18 = vmul.f32 %v483_v7, %v483_v7  ;;  %v496_v6 = vsub.f32 %v208_v1, %v352_v2 }
 0x114   :  { %v758_v28 = vadd.f32 %v757_v23, %v614_v17  ;;  %v485_v17 = vsub.f32 %v197_v10, %v341_v11  ;;  %v628_v23 = vmul.f32 %v484_v12, %v484_v12  ;;  %v640_v11 = vmul.f32 %v496_v6, %v496_v6 }
 0x116   :  { %v759_v33 = vadd.f32 %v758_v28, %v615_v22  ;;  %v486_v22 = vsub.f32 %v198_v15, %v342_v16  ;;  %v629_v28 = vmul.f32 %v485_v17, %v485_v17 }
 0x118   :  { %v760_v38 = vadd.f32 %v759_v33, %v616_v27  ;;  %v487_v27 = vsub.f32 %v199_v20, %v343_v21  ;;  %v630_v33 = vmul.f32 %v486_v22, %v486_v22 }
 0x11a   :  { %v761_v43 = vadd.f32 %v760_v38, %v617_v32  ;;  %v488_v32 = vsub.f32 %v200_v25, %v344_v26  ;;  %v631_v38 = vmul.f32 %v487_v27, %v487_v27 }
 0x11c   :  { %v762_v48 = vadd.f32 %v761_v43, %v618_v37  ;;  %v489_v37 = vsub.f32 %v201_v30, %v345_v31  ;;  %v632_v43 = vmul.f32 %v488_v32, %v488_v32 }
 0x11e   :  { %v763_v53 = vadd.f32 %v762_v48, %v619_v42  ;;  %v490_v42 = vsub.f32 %v202_v35, %v346_v36  ;;  %v633_v48 = vmul.f32 %v489_v37, %v489_v37 }
 0x120   :  { %v764_v58 = vadd.f32 %v763_v53, %v620_v47  ;;  %v491_v47 = vsub.f32 %v203_v40, %v347_v41  ;;  %v634_v53 = vmul.f32 %v490_v42, %v490_v42 }
 0x122   :  { %v765_v63 = vadd.f32 %v764_v58, %v621_v52  ;;  %v492_v52 = vsub.f32 %v204_v45, %v348_v46  ;;  %v635_v58 = vmul.f32 %v491_v47, %v491_v47 }
 0x124   :  { %v766_v4 = vadd.f32 %v765_v63, %v622_v57  ;;  %v493_v57 = vsub.f32 %v205_v50, %v349_v51  ;;  %v636_v63 = vmul.f32 %v492_v52, %v492_v52 }
 0x126   :  { %v767_v9 = vadd.f32 %v766_v4, %v623_v62  ;;  %v494_v62 = vsub.f32 %v206_v55, %v350_v56  ;;  %v637_v4 = vmul.f32 %v493_v57, %v493_v57 }
 0x128   :  { %v768_v14 = vadd.f32 %v767_v9, %v624_v3  ;;  %v495_v3 = vsub.f32 %v207_v60, %v351_v61  ;;  %v638_v7 = vmul.f32 %v494_v62, %v494_v62 }
 0x12a   :  { %v769_v19 = vadd.f32 %v768_v14, %v625_v8  ;;  %v639_v9 = vmul.f32 %v495_v3, %v495_v3 }
 0x12c   :  { %v770_v24 = vadd.f32 %v769_v19, %v626_v13 }
 0x12e   :  { %v771_v29 = vadd.f32 %v770_v24, %v627_v18 }
 0x130   :  { %v772_v34 = vadd.f32 %v771_v29, %v628_v23 }
 0x132   :  { %v773_v39 = vadd.f32 %v772_v34, %v629_v28 }
 0x134   :  { %v774_v44 = vadd.f32 %v773_v39, %v630_v33 }
 0x136   :  { %v775_v49 = vadd.f32 %v774_v44, %v631_v38 }
 0x138   :  { %v776_v54 = vadd.f32 %v775_v49, %v632_v43 }
 0x13a   :  { %v777_v59 = vadd.f32 %v776_v54, %v633_v48 }
 0x13c   :  { %v778_v0 = vadd.f32 %v777_v59, %v634_v53 }
 0x13e   :  { %v779_v5 = vadd.f32 %v778_v0, %v635_v58 }
 0x140   :  { %v780_v8 = vadd.f32 %v779_v5, %v636_v63 }
 0x142   :  { %v781_v10 = vadd.f32 %v780_v8, %v637_v4 }
 0x144   :  { %v782_v12 = vadd.f32 %v781_v10, %v638_v7 }
 0x146   :  { %v783_v13 = vadd.f32 %v782_v12, %v639_v9 }
 0x148   :  { %v784_v14 = vadd.f32 %v783_v13, %v640_v11 }
 0x14a   :  { %791 = vst [vmem:[#allocation8] sm:$0xff] %v784_v14 }
 0x14b   :  { %872 = shalt.err (!%p869_p6)
}
 0x14c   :  { %s873_s10 = scalar_lea.hbm %s947_s2, 128 }
 0x14d   :  { %p874_p7 = scmp.ne.s32.totalorder %s947_s2, %s873_s10  ;;  %p877_p8 = scmp.lt.u32.totalorder %s873_s10, %s947_s2 }
 0x14f   :  { %p879_p9 = pnand %p877_p8, %p874_p7 }
 0x151   :  { %882 = shalt.err (!%p879_p9)
}
 0x152   :  { %801 = dma.vmem_to_hbm [thread:$0]  %s799_s6, 128, %s947_s2, [#allocation5]  }
 0x153   :  { %887 = dma.done.wait [#allocation5], 128  }
 0x154   :  { %888 = vsyncadd [#allocation5], 4294967168 }
 0x155   :  { %805 = vsyncpa [#allocation4], 1 }
 0x156   :  { %806 = vsyncpa [#allocation7], 1 }
 0x157   :  { %807 = vsyncpa [#allocation5], 1 }

</bundles_post_ra>
